<compile_context>
chip_gen: v7x
topology: tpu7x:2x2x1
jax: 0.10.0
libtpu: 0.0.40
codegen_flags: <defaults>
</compile_context>

<pallas_src>
import functools

import jax
import jax.numpy as jnp
from jax.experimental import pallas as pl
from jax.experimental.pallas import tpu as pltpu


def _round_up(x, m):
    return (x + m - 1) // m * m


def _pad2d(a, rows, cols):
    a = jnp.asarray(a)
    return jnp.pad(a, ((0, rows - a.shape[0]), (0, cols - a.shape[1])))


def _vmem_budget_bytes():
    """~85% of per-core physical VMEM (headroom for Mosaic internal scratch/semaphores)."""
    try:
        cap = int(pltpu.get_tpu_info().vmem_capacity_bytes)
    except Exception:
        cap = 64 << 20  # v7x per-TensorCore size: a safe lower bound on every chip
    return int(cap * 0.85)


# --------------------------------------------------------------------------- kernel
def glu_kernel(x_ref, w12_ref, b12_ref, w3_ref, b3_ref, o_ref, *, d2, d2_chunk):
    """One row-tile of: out = (silu(x@W1 + b1) * (x@W2 + b2)) @ W3 + b3."""
    x = x_ref[...]                                                 # (tm, d1p)

    if d2_chunk >= d2:
        # Single fused pass: [o1 | o2] = x @ [W1 | W2] + [b1 | b2]  (one MXU sweep over x)
        o12 = jnp.dot(x, w12_ref[...], preferred_element_type=jnp.float32) + b12_ref[...]
        o1 = o12[:, :d2]                                           # lane-aligned (d2 % 128 == 0)
        o2 = o12[:, d2:]
        gate = o1 * jax.nn.sigmoid(o1)                             # SiLU in f32 (EUP + VPU)
        h = (gate * o2).astype(w3_ref.dtype)
        out = jnp.dot(h, w3_ref[...], preferred_element_type=jnp.float32) + b3_ref[...]
        o_ref[...] = out.astype(o_ref.dtype)
    else:
        # d2-chunked path: bounds the f32 intermediates (o1/o2/h) so a big row tile plus
        # resident weights still fits the per-core VMEM budget (matters on v7x's 64 MiB).
        # Static slices at multiples of 128 -> pure views, no relayout, same total MXU work.
        n_chunks = d2 // d2_chunk
        acc = jnp.zeros((x.shape[0], o_ref.shape[1]), jnp.float32)
        for c in range(n_chunks):                                  # static, fully unrolled
            off = c * d2_chunk
            o1 = (jnp.dot(x, w12_ref[:, off:off + d2_chunk],
                          preferred_element_type=jnp.float32)
                  + b12_ref[:, off:off + d2_chunk])
            o2 = (jnp.dot(x, w12_ref[:, d2 + off:d2 + off + d2_chunk],
                          preferred_element_type=jnp.float32)
                  + b12_ref[:, d2 + off:d2 + off + d2_chunk])
            h = (o1 * jax.nn.sigmoid(o1) * o2).astype(w3_ref.dtype)
            acc = acc + jnp.dot(h, w3_ref[off:off + d2_chunk, :],
                                preferred_element_type=jnp.float32)
        o_ref[...] = (acc + b3_ref[...]).astype(o_ref.dtype)


# --------------------------------------------------------------------- param prep (one-time)
def prepare_glu_params(w1, b1, w2, b2, w3, b3):
    """One-time weight fusion + lane padding. Cache the result; do NOT redo per call.

    w1, w2: (d1, d2); w3: (d2, d1); b1, b2: (d2,)/(1, d2); b3: (d1,)/(1, d1).
    Returns (w12, b12, w3p, b3p) with d1/d2 padded to multiples of 128.
    Padding is exact: padded W/b entries are zero, so silu(0) * o2 contributes nothing,
    and padded x/out columns are sliced away in the wrapper.
    """
    w1 = jnp.asarray(w1); w2 = jnp.asarray(w2); w3 = jnp.asarray(w3)
    b1 = jnp.asarray(b1).reshape(1, -1)
    b2 = jnp.asarray(b2).reshape(1, -1)
    b3 = jnp.asarray(b3).reshape(1, -1)
    d1, d2 = w1.shape
    d1p, d2p = _round_up(d1, 128), _round_up(d2, 128)
    w12 = jnp.concatenate([_pad2d(w1, d1p, d2p), _pad2d(w2, d1p, d2p)], axis=1)   # (d1p, 2*d2p)
    b12 = jnp.concatenate([_pad2d(b1, 1, d2p), _pad2d(b2, 1, d2p)], axis=1)       # (1, 2*d2p)
    w3p = _pad2d(w3, d2p, d1p)                                                    # (d2p, d1p)
    b3p = _pad2d(b3, 1, d1p)                                                      # (1, d1p)
    return w12, b12, w3p, b3p


# ------------------------------------------------------------------------------ forward
@functools.partial(jax.jit, static_argnames=("tm", "d2_chunk", "single_buffer_weights"))
def glu_forward_fused(x, w12, b12, w3, b3, *, tm=None, d2_chunk=None,
                      single_buffer_weights=True):
    """x: (..., d1) with the ORIGINAL d1; fused/padded weights from prepare_glu_params()."""
    orig_shape = x.shape
    d1 = orig_shape[-1]
    d1p = w12.shape[0]
    d2p = w12.shape[1] // 2

    M = 1
    for s in orig_shape[:-1]:
        M *= s
    Mp = max(_round_up(M, 8), 8)

    x2d = x.reshape(M, d1)
    if (Mp, d1p) != (M, d1):
        x2d = jnp.pad(x2d, ((0, Mp - M), (0, d1p - d1)))           # zero rows/cols: exact

    x_itemsize = jnp.dtype(x.dtype).itemsize
    weight_bytes = ((w12.size + b12.size) * jnp.dtype(w12.dtype).itemsize
                    + (w3.size + b3.size) * jnp.dtype(w3.dtype).itemsize)
    if not single_buffer_weights:
        weight_bytes *= 2                                          # default double-buffering
    vmem_budget = _vmem_budget_bytes()

    # d2 chunk (static): bound the f32 intermediates for large d2.
    if d2_chunk is None:
        if d2p <= 512:
            d2_chunk = d2p
        else:
            c = 512
            while c >= 128 and d2p % c:
                c -= 128
            d2_chunk = c if c >= 128 else d2p
    if d2_chunk <= 0 or d2p % d2_chunk or d2_chunk % 128:
        d2_chunk = d2p

    # Row tile (static): biggest candidate whose streamed tiles + f32 temporaries fit
    # next to the resident weights; multiples of 256/128 keep the MXU fed.
    if tm is None:
        remaining = max(vmem_budget - weight_bytes, 4 << 20)
        tm = 128
        for cand in (1024, 512, 256, 128):
            stream = 4 * cand * d1p * x_itemsize                   # x + out tiles, double-buffered
            interm = cand * (3 * d2_chunk + d1p) * 4               # o1, o2, h, acc (f32 upper bound)
            if stream + interm <= remaining:
                tm = cand
                break
    # Keep several steps per core when M is large (software pipelining + megacore balance).
    if M >= 2048 and pl.cdiv(Mp, tm) < 8:
        tm = max(256, _round_up(pl.cdiv(Mp, 8), 256))
    tm_eff = min(_round_up(tm, 8), Mp)
    grid = (pl.cdiv(Mp, tm_eff),)

    # VMEM limit: what this launch actually needs + headroom, capped at ~85% of physical.
    tile_bytes = 4 * tm_eff * d1p * x_itemsize
    interm_bytes = tm_eff * (3 * d2_chunk + d1p) * 4
    vmem_limit = int(min(max(weight_bytes + tile_bytes + interm_bytes + (4 << 20), 32 << 20),
                         vmem_budget))

    resident = dict(pipeline_mode=pl.Buffered(1)) if single_buffer_weights else {}
    # TODO(synk): if single-buffered weight_bytes still exceeds the per-core VMEM budget
    # (very large d1/d2 on v7x's 64 MiB), add a second "arbitrary" grid axis that streams
    # [W1|W2] column-blocks / W3 row-blocks and accumulates into an f32 VMEM scratch.

    out2d = pl.pallas_call(
        functools.partial(glu_kernel, d2=d2p, d2_chunk=d2_chunk),
        out_shape=jax.ShapeDtypeStruct((Mp, d1p), x.dtype),
        grid_spec=pltpu.PrefetchScalarGridSpec(
            num_scalar_prefetch=0,
            grid=grid,
            in_specs=[
                # Streamed x row-tile (double-buffered by default; on v5e bump to
                # pipeline_mode=pl.Buffered(3) if the x DMA shows up exposed in a profile).
                pl.BlockSpec((tm_eff, d1p), lambda i: (i, 0)),
                # Grid-invariant (resident) weights/biases: single-buffered.
                pl.BlockSpec((d1p, 2 * d2p), lambda i: (0, 0), **resident),   # [W1 | W2]
                pl.BlockSpec((1, 2 * d2p), lambda i: (0, 0), **resident),     # [b1 | b2]
                pl.BlockSpec((d2p, d1p), lambda i: (0, 0), **resident),       # W3
                pl.BlockSpec((1, d1p), lambda i: (0, 0), **resident),         # b3
            ],
            out_specs=pl.BlockSpec((tm_eff, d1p), lambda i: (i, 0)),
        ),
        compiler_params=pltpu.CompilerParams(
            dimension_semantics=("parallel",),
            vmem_limit_bytes=vmem_limit,
        ),
    )(x2d, w12, b12, w3, b3)

    return out2d[:M, :d1].reshape(orig_shape)


def glu_apply(x, fused_params, **kwargs):
    """Fused forward with a safety fallback to default (double) weight buffering."""
    try:
        return glu_forward_fused(x, *fused_params, **kwargs)
    except Exception:  # pragma: no cover — e.g. if pl.Buffered(1) is unsupported here
        return glu_forward_fused(x, *fused_params, single_buffer_weights=False, **kwargs)


def glu_reference(x, w1, b1, w2, b2, w3, b3):
    """Pure-JAX reference matching the PyTorch forward (SiLU gate, identity fina_act)."""
    o1 = x @ w1 + jnp.reshape(b1, (-1,))
    gate = o1 * jax.nn.sigmoid(o1)
    o2 = x @ w2 + jnp.reshape(b2, (-1,))
    return (gate * o2) @ w3 + jnp.reshape(b3, (-1,))


if __name__ == "__main__":
    key = jax.random.PRNGKey(0)

    def make_case(k, B, S, d1, d2):
        kx, k1, k2, k3, kb1, kb2, kb3 = jax.random.split(k, 7)
        x = jax.random.normal(kx, (B, S, d1), dtype=jnp.float32)
        w1 = jax.random.uniform(k1, (d1, d2), jnp.float32, -1.0, 1.0) / jnp.sqrt(d1)
        w2 = jax.random.uniform(k2, (d1, d2), jnp.float32, -1.0, 1.0) / jnp.sqrt(d1)
        w3 = jax.random.uniform(k3, (d2, d1), jnp.float32, -1.0, 1.0) / jnp.sqrt(d2)
        b1 = jax.random.uniform(kb1, (1, d2), jnp.float32, -1.0, 1.0) / jnp.sqrt(d1)
        b2 = jax.random.uniform(kb2, (1, d2), jnp.float32, -1.0, 1.0) / jnp.sqrt(d1)
        b3 = jax.random.uniform(kb3, (1, d1), jnp.float32, -1.0, 1.0) / jnp.sqrt(d2)
        return x, (w1, b1, w2, b2, w3, b3)

    ka, kb = jax.random.split(key)

    # Case 1: small shapes consistent with the module (batch=2, seq=8, d1=32, d2=64).
    # Exercises the single fused-pass path (d1/d2 lane-padded to 128 in prepare).
    x, params = make_case(ka, B=2, S=8, d1=32, d2=64)
    fused = prepare_glu_params(*params)        # one-time fusion + padding (outside hot path)
    out = glu_apply(x, fused)
    jax.block_until_ready(out)
    ref = glu_reference(x, *params)
    assert out.shape == x.shape
    assert jnp.allclose(out, ref, atol=1e-4, rtol=1e-4), "case 1 mismatch vs reference"

    # Case 2: exercises the in-kernel d2-chunked path used for large-d2 layers.
    x2, params2 = make_case(kb, B=2, S=64, d1=128, d2=256)
    fused2 = prepare_glu_params(*params2)
    out2 = glu_apply(x2, fused2, d2_chunk=128)
    jax.block_until_ready(out2)
    ref2 = glu_reference(x2, *params2)
    assert jnp.allclose(out2, ref2, atol=1e-4, rtol=1e-4), "case 2 mismatch vs reference"

    print("KERNEL_OK")
</pallas_src>

<mosaic_0001>
module attributes {stable_mosaic.version = 11 : i64} {
  func.func @glu_kernel(%arg0: i32, %arg1: memref<16x128xf32, #tpu.memory_space<vmem>>, %arg2: memref<128x256xf32, #tpu.memory_space<vmem>>, %arg3: memref<1x256xf32, #tpu.memory_space<vmem>>, %arg4: memref<128x128xf32, #tpu.memory_space<vmem>>, %arg5: memref<1x128xf32, #tpu.memory_space<vmem>>, %arg6: memref<16x128xf32, #tpu.memory_space<vmem>>) attributes {dimension_semantics = [#tpu.dimension_semantics<parallel>], iteration_bounds = array<i64: 1>, scalar_prefetch = 0 : i64, scratch_operands = 0 : i64, tpu.core_type = #tpu.core_type<tc>, window_params = [{transform_indices = @transform_0, window_bounds = array<i64: 16, 128>}, {pipeline_mode = #tpu.pipeline_mode<synchronous>, transform_indices = @transform_1, window_bounds = array<i64: 128, 256>}, {pipeline_mode = #tpu.pipeline_mode<synchronous>, transform_indices = @transform_2, window_bounds = array<i64: 1, 256>}, {pipeline_mode = #tpu.pipeline_mode<synchronous>, transform_indices = @transform_3, window_bounds = array<i64: 128, 128>}, {pipeline_mode = #tpu.pipeline_mode<synchronous>, transform_indices = @transform_4, window_bounds = array<i64: 1, 128>}, {transform_indices = @transform_5, window_bounds = array<i64: 16, 128>}]} {
    %c0 = arith.constant 0 : index
    %c0_0 = arith.constant 0 : index
    %0 = vector.load %arg1[%c0, %c0_0] : memref<16x128xf32, #tpu.memory_space<vmem>>, vector<16x128xf32>
    %c0_1 = arith.constant 0 : index
    %c0_2 = arith.constant 0 : index
    %1 = vector.load %arg2[%c0_1, %c0_2] : memref<128x256xf32, #tpu.memory_space<vmem>>, vector<128x256xf32>
    %cst = arith.constant dense<0.000000e+00> : vector<16x256xf32>
    %2 = tpu.matmul %0, %1, %cst {dimension_numbers = #tpu.dot_dimension_numbers<[1], [0], [0], [1], [0, 0, 1, 1], [], []>} : vector<16x128xf32>, vector<128x256xf32>, vector<16x256xf32> -> vector<16x256xf32>
    %c0_3 = arith.constant 0 : index
    %c0_4 = arith.constant 0 : index
    %3 = vector.load %arg3[%c0_3, %c0_4] : memref<1x256xf32, #tpu.memory_space<vmem>>, vector<1x256xf32>
    %4 = vector.broadcast %3 : vector<1x256xf32> to vector<16x256xf32>
    %5 = arith.addf %2, %4 : vector<16x256xf32>
    %6 = vector.extract_strided_slice %5 {offsets = [0, 0], sizes = [16, 128], strides = [1, 1]} : vector<16x256xf32> to vector<16x128xf32>
    %7 = vector.extract_strided_slice %5 {offsets = [0, 128], sizes = [16, 128], strides = [1, 1]} : vector<16x256xf32> to vector<16x128xf32>
    %8 = arith.negf %6 : vector<16x128xf32>
    %9 = math.exp %8 : vector<16x128xf32>
    %cst_5 = arith.constant 1.000000e+00 : f32
    %10 = vector.broadcast %cst_5 : f32 to vector<16x128xf32>
    %11 = arith.addf %10, %9 : vector<16x128xf32>
    %12 = arith.divf %10, %11 : vector<16x128xf32>
    %13 = arith.mulf %6, %12 : vector<16x128xf32>
    %14 = arith.mulf %13, %7 : vector<16x128xf32>
    %c0_6 = arith.constant 0 : index
    %c0_7 = arith.constant 0 : index
    %15 = vector.load %arg4[%c0_6, %c0_7] : memref<128x128xf32, #tpu.memory_space<vmem>>, vector<128x128xf32>
    %cst_8 = arith.constant dense<0.000000e+00> : vector<16x128xf32>
    %16 = tpu.matmul %14, %15, %cst_8 {dimension_numbers = #tpu.dot_dimension_numbers<[1], [0], [0], [1], [0, 0, 1, 1], [], []>} : vector<16x128xf32>, vector<128x128xf32>, vector<16x128xf32> -> vector<16x128xf32>
    %c0_9 = arith.constant 0 : index
    %c0_10 = arith.constant 0 : index
    %17 = vector.load %arg5[%c0_9, %c0_10] : memref<1x128xf32, #tpu.memory_space<vmem>>, vector<1x128xf32>
    %18 = vector.broadcast %17 : vector<1x128xf32> to vector<16x128xf32>
    %19 = arith.addf %16, %18 : vector<16x128xf32>
    %c0_11 = arith.constant 0 : index
    %c0_12 = arith.constant 0 : index
    %20 = vector.load %arg6[%c0_11, %c0_12] : memref<16x128xf32, #tpu.memory_space<vmem>>, vector<16x128xf32>
    tpu.vector_store %arg6[%c0_11, %c0_12], %19 {strides = array<i32>} : memref<16x128xf32, #tpu.memory_space<vmem>>, vector<16x128xf32>,
    return
  }
  func.func @transform_0(%arg0: i32) -> (i32, i32) {
    %c0_i32 = arith.constant 0 : i32
    %c0_i32_0 = arith.constant 0 : i32
    return %arg0, %c0_i32 : i32, i32
  }
  func.func @transform_1(%arg0: i32) -> (i32, i32) {
    %c0_i32 = arith.constant 0 : i32
    %c0_i32_0 = arith.constant 0 : i32
    %c0_i32_1 = arith.constant 0 : i32
    return %c0_i32, %c0_i32_0 : i32, i32
  }
  func.func @transform_2(%arg0: i32) -> (i32, i32) {
    %c0_i32 = arith.constant 0 : i32
    %c0_i32_0 = arith.constant 0 : i32
    %c0_i32_1 = arith.constant 0 : i32
    return %c0_i32, %c0_i32_0 : i32, i32
  }
  func.func @transform_3(%arg0: i32) -> (i32, i32) {
    %c0_i32 = arith.constant 0 : i32
    %c0_i32_0 = arith.constant 0 : i32
    %c0_i32_1 = arith.constant 0 : i32
    return %c0_i32, %c0_i32_0 : i32, i32
  }
  func.func @transform_4(%arg0: i32) -> (i32, i32) {
    %c0_i32 = arith.constant 0 : i32
    %c0_i32_0 = arith.constant 0 : i32
    %c0_i32_1 = arith.constant 0 : i32
    return %c0_i32, %c0_i32_0 : i32, i32
  }
  func.func @transform_5(%arg0: i32) -> (i32, i32) {
    %c0_i32 = arith.constant 0 : i32
    %c0_i32_0 = arith.constant 0 : i32
    return %arg0, %c0_i32 : i32, i32
  }
}

module attributes {stable_mosaic.version = 11 : i64} {
  func.func @glu_kernel(%arg0: i32, %arg1: memref<16x128xf32, #tpu.memory_space<vmem>>, %arg2: memref<128x256xf32, #tpu.memory_space<vmem>>, %arg3: memref<1x256xf32, #tpu.memory_space<vmem>>, %arg4: memref<128x128xf32, #tpu.memory_space<vmem>>, %arg5: memref<1x128xf32, #tpu.memory_space<vmem>>, %arg6: memref<16x128xf32, #tpu.memory_space<vmem>>) attributes {dimension_semantics = [#tpu.dimension_semantics<parallel>], iteration_bounds = array<i64: 1>, scalar_prefetch = 0 : i64, scratch_operands = 0 : i64, tpu.core_type = #tpu.core_type<tc>, window_params = [{transform_indices = @transform_0, window_bounds = array<i64: 16, 128>}, {pipeline_mode = #tpu.pipeline_mode<synchronous>, transform_indices = @transform_1, window_bounds = array<i64: 128, 256>}, {pipeline_mode = #tpu.pipeline_mode<synchronous>, transform_indices = @transform_2, window_bounds = array<i64: 1, 256>}, {pipeline_mode = #tpu.pipeline_mode<synchronous>, transform_indices = @transform_3, window_bounds = array<i64: 128, 128>}, {pipeline_mode = #tpu.pipeline_mode<synchronous>, transform_indices = @transform_4, window_bounds = array<i64: 1, 128>}, {transform_indices = @transform_5, window_bounds = array<i64: 16, 128>}]} {
    %c0 = arith.constant 0 : index
    %c0_0 = arith.constant 0 : index
    %0 = vector.load %arg1[%c0, %c0_0] : memref<16x128xf32, #tpu.memory_space<vmem>>, vector<16x128xf32>
    %c0_1 = arith.constant 0 : index
    %c0_2 = arith.constant 0 : index
    %1 = vector.load %arg2[%c0_1, %c0_2] : memref<128x256xf32, #tpu.memory_space<vmem>>, vector<128x256xf32>
    %cst = arith.constant dense<0.000000e+00> : vector<16x256xf32>
    %2 = tpu.matmul %0, %1, %cst {dimension_numbers = #tpu.dot_dimension_numbers<[1], [0], [0], [1], [0, 0, 1, 1], [], []>} : vector<16x128xf32>, vector<128x256xf32>, vector<16x256xf32> -> vector<16x256xf32>
    %c0_3 = arith.constant 0 : index
    %c0_4 = arith.constant 0 : index
    %3 = vector.load %arg3[%c0_3, %c0_4] : memref<1x256xf32, #tpu.memory_space<vmem>>, vector<1x256xf32>
    %4 = vector.broadcast %3 : vector<1x256xf32> to vector<16x256xf32>
    %5 = arith.addf %2, %4 : vector<16x256xf32>
    %6 = vector.extract_strided_slice %5 {offsets = [0, 0], sizes = [16, 128], strides = [1, 1]} : vector<16x256xf32> to vector<16x128xf32>
    %7 = vector.extract_strided_slice %5 {offsets = [0, 128], sizes = [16, 128], strides = [1, 1]} : vector<16x256xf32> to vector<16x128xf32>
    %8 = arith.negf %6 : vector<16x128xf32>
    %9 = math.exp %8 : vector<16x128xf32>
    %cst_5 = arith.constant 1.000000e+00 : f32
    %10 = vector.broadcast %cst_5 : f32 to vector<16x128xf32>
    %11 = arith.addf %10, %9 : vector<16x128xf32>
    %12 = arith.divf %10, %11 : vector<16x128xf32>
    %13 = arith.mulf %6, %12 : vector<16x128xf32>
    %14 = arith.mulf %13, %7 : vector<16x128xf32>
    %c0_6 = arith.constant 0 : index
    %c0_7 = arith.constant 0 : index
    %15 = vector.load %arg4[%c0_6, %c0_7] : memref<128x128xf32, #tpu.memory_space<vmem>>, vector<128x128xf32>
    %cst_8 = arith.constant dense<0.000000e+00> : vector<16x128xf32>
    %16 = tpu.matmul %14, %15, %cst_8 {dimension_numbers = #tpu.dot_dimension_numbers<[1], [0], [0], [1], [0, 0, 1, 1], [], []>} : vector<16x128xf32>, vector<128x128xf32>, vector<16x128xf32> -> vector<16x128xf32>
    %c0_9 = arith.constant 0 : index
    %c0_10 = arith.constant 0 : index
    %17 = vector.load %arg5[%c0_9, %c0_10] : memref<1x128xf32, #tpu.memory_space<vmem>>, vector<1x128xf32>
    %18 = vector.broadcast %17 : vector<1x128xf32> to vector<16x128xf32>
    %19 = arith.addf %16, %18 : vector<16x128xf32>
    %c0_11 = arith.constant 0 : index
    %c0_12 = arith.constant 0 : index
    %20 = vector.load %arg6[%c0_11, %c0_12] : memref<16x128xf32, #tpu.memory_space<vmem>>, vector<16x128xf32>
    tpu.vector_store %arg6[%c0_11, %c0_12], %19 {strides = array<i32>} : memref<16x128xf32, #tpu.memory_space<vmem>>, vector<16x128xf32>,
    return
  }
  func.func @transform_0(%arg0: i32) -> (i32, i32) {
    %c0_i32 = arith.constant 0 : i32
    %c0_i32_0 = arith.constant 0 : i32
    return %arg0, %c0_i32 : i32, i32
  }
  func.func @transform_1(%arg0: i32) -> (i32, i32) {
    %c0_i32 = arith.constant 0 : i32
    %c0_i32_0 = arith.constant 0 : i32
    %c0_i32_1 = arith.constant 0 : i32
    return %c0_i32, %c0_i32_0 : i32, i32
  }
  func.func @transform_2(%arg0: i32) -> (i32, i32) {
    %c0_i32 = arith.constant 0 : i32
    %c0_i32_0 = arith.constant 0 : i32
    %c0_i32_1 = arith.constant 0 : i32
    return %c0_i32, %c0_i32_0 : i32, i32
  }
  func.func @transform_3(%arg0: i32) -> (i32, i32) {
    %c0_i32 = arith.constant 0 : i32
    %c0_i32_0 = arith.constant 0 : i32
    %c0_i32_1 = arith.constant 0 : i32
    return %c0_i32, %c0_i32_0 : i32, i32
  }
  func.func @transform_4(%arg0: i32) -> (i32, i32) {
    %c0_i32 = arith.constant 0 : i32
    %c0_i32_0 = arith.constant 0 : i32
    %c0_i32_1 = arith.constant 0 : i32
    return %c0_i32, %c0_i32_0 : i32, i32
  }
  func.func @transform_5(%arg0: i32) -> (i32, i32) {
    %c0_i32 = arith.constant 0 : i32
    %c0_i32_0 = arith.constant 0 : i32
    return %arg0, %c0_i32 : i32, i32
  }
}

</mosaic_0001>

<bundles_post_ra>
// kernel: glu_forward_fused.1
= control target key start
LH: loop header
LB: loop body
LE: loop exit
PB: predicated region body
PF: predicated region fallthrough
CT: control target
= control target key end

     0   :  { %10 = vsyncpa [#allocation3], 0  ;;  %s557_s0 = inlined_call_operand.vmem [shape: f32[16,128], index: 0, kind: input, shape index: {}]   ;;  %s558_s1 = inlined_call_operand.hbm [shape: f32[128,256], index: 1, kind: input, shape index: {}]   ;;  %s559_s2 = inlined_call_operand.vmem [shape: f32[1,256], index: 2, kind: input, shape index: {}]   ;;  %s560_s3 = inlined_call_operand.hbm [shape: f32[128,128], index: 3, kind: input, shape index: {}]   ;;  %s561_s4 = inlined_call_operand.vmem [shape: f32[1,128], index: 4, kind: input, shape index: {}]   ;;  %s562_s5 = inlined_call_operand.vmem [shape: f32[16,128], index: 5, kind: output, shape index: {}]  }
   0x1   :  { %11 = vsyncpa [#allocation5], 0  ;;  %s476_s18 = smov [#allocation2]   ;;  %s428_s22 = scalar_lea.hbm %s558_s1, 4096 }
   0x2   :  { %s19_s19 = sshll.u32 %s476_s18, 4  ;;  %p429_p0 = scmp.ne.s32.totalorder %s558_s1, %s428_s22  ;;  %s20_s19 = int_to_ptr.vmem [resolvable:$true] %s19_s19 }
   0x3   :  { %p432_p1 = scmp.lt.u32.totalorder %s428_s22, %s558_s1 }
   0x5   :  { %p434_p2 = pnand %p432_p1, %p429_p0 }
   0x7   :  { %437 = shalt.err (!%p434_p2)
}
   0x8   :  { %s438_s27 = scalar_lea.vmem %s20_s19, 4096  ;;  %p443_p4 = scmp.lt.s32.totalorder %s20_s19, %s20_s19 }
   0x9   :  { %p439_p3 = scmp.ne.s32.totalorder %s20_s19, %s438_s27  ;;  %p444_p5 = scmp.lt.s32.totalorder %s438_s27, %s438_s27 }
   0xb   :  { %p445_p6 = por %p444_p5, %p443_p4 }
   0xd   :  { %p446_p7 = pnand %p445_p6, %p439_p3 }
   0xf   :  { %449 = shalt.err (!%p446_p7)
}
  0x10   :  { %s477_s28 = smov 256   ;;  %s478_s29 = smov 16  }
  0x11   :  { %25 = dma.hbm_to_vmem [thread:$0]  %s558_s1, 4096, %s20_s19, [#allocation3], %s477_s28, %s477_s28, %s478_s29  }
  0x12   :  { %s479_s7 = smov [#allocation4]   ;;  %s450_s11 = scalar_lea.hbm %s560_s3, 2048 }
  0x13   :  { %s33_s8 = sshll.u32 %s479_s7, 4  ;;  %p451_p8 = scmp.ne.s32.totalorder %s560_s3, %s450_s11  ;;  %s34_s8 = int_to_ptr.vmem [resolvable:$true] %s33_s8 }
  0x14   :  { %p454_p9 = scmp.lt.u32.totalorder %s450_s11, %s560_s3 }
  0x16   :  { %p456_p10 = pnand %p454_p9, %p451_p8 }
  0x18   :  { %459 = shalt.err (!%p456_p10)
}
  0x19   :  { %s460_s16 = scalar_lea.vmem %s34_s8, 2048  ;;  %p465_p12 = scmp.lt.s32.totalorder %s34_s8, %s34_s8 }
  0x1a   :  { %p461_p11 = scmp.ne.s32.totalorder %s34_s8, %s460_s16  ;;  %p466_p13 = scmp.lt.s32.totalorder %s460_s16, %s460_s16 }
  0x1c   :  { %p467_p0 = por %p466_p13, %p465_p12 }
  0x1e   :  { %p468_p1 = pnand %p467_p0, %p461_p11 }
  0x20   :  { %471 = shalt.err (!%p468_p1)
}
  0x21   :  { %s480_s1 = smov 128   ;;  %s481_s17 = smov 8  }
  0x22   :  { %39 = dma.hbm_to_vmem [thread:$0]  %s560_s3, 2048, %s34_s8, [#allocation5], %s480_s1, %s480_s1, %s481_s17  }
  0x23   :  { %472 = dma.done.wait [#allocation3], 4096  }
  0x24   :  { %473 = vsyncadd [#allocation3], 4294963200 }
  0x25   :  { %474 = dma.done.wait [#allocation5], 2048  }
  0x26   :  { %475 = vsyncadd [#allocation5], 4294965248  ;;  %v482_v0 = vmov 0.0   ;;  %v51_v1 = vld [vmem:[#allocation2 + $0x8] sm:$0xff]  ;;  %v53_v2 = vld [vmem:[#allocation2 + $0x18] sm:$0xff] }
  0x27   :  { %158 = vmatprep.mubr.f32.mxu0 %v482_v0  ;;  %v50_v3 = vld [vmem:[#allocation2] sm:$0xff]  ;;  %v349_v4 = vpack.c.bf16 %v53_v2, %v51_v1  ;;  %v52_v5 = vld [vmem:[#allocation2 + $0x10] sm:$0xff]  ;;  %v55_v6 = vld [vmem:[#allocation2 + $0x28] sm:$0xff] }
  0x28   :  { %v57_v7 = vld [vmem:[#allocation2 + $0x38] sm:$0xff]  ;;  %v351_v8 = vpack.c.bf16 %v52_v5, %v50_v3  ;;  %v54_v10 = vld [vmem:[#allocation2 + $0x20] sm:$0xff]  ;;  %v56_v11 = vld [vmem:[#allocation2 + $0x30] sm:$0xff] }
  0x29   :  { %v353_v9 = vpack.c.bf16 %v57_v7, %v55_v6  ;;  %v59_v12 = vld [vmem:[#allocation2 + $0x48] sm:$0xff]  ;;  %350 = vmatprep.subr.bf16.mxu0 %v349_v4  ;;  %v61_v13 = vld [vmem:[#allocation2 + $0x58] sm:$0xff]  ;;  %v355_v14 = vpack.c.bf16 %v56_v11, %v54_v10  ;;  %v58_v16 = vld [vmem:[#allocation2 + $0x40] sm:$0xff]  ;;  %v84_v11 = vlaneseq }
  0x2a   :  { %352 = vmatpush1.bf16.msra.mxu0 %v351_v8  ;;  %v357_v15 = vpack.c.bf16 %v61_v13, %v59_v12  ;;  %v60_v17 = vld [vmem:[#allocation2 + $0x50] sm:$0xff]  ;;  %v63_v18 = vld [vmem:[#allocation2 + $0x68] sm:$0xff]  ;;  %v65_v19 = vld [vmem:[#allocation2 + $0x78] sm:$0xff] }
  0x2b   :  { %354 = vmatprep.subr.bf16.mxu0 %v353_v9  ;;  %v359_v20 = vpack.c.bf16 %v60_v17, %v58_v16  ;;  %v361_v21 = vpack.c.bf16 %v65_v19, %v63_v18  ;;  %v62_v22 = vld [vmem:[#allocation2 + $0x60] sm:$0xff]  ;;  %v64_v23 = vld [vmem:[#allocation2 + $0x70] sm:$0xff]  ;;  %v67_v24 = vld [vmem:[#allocation2 + $0x88] sm:$0xff]  ;;  %v85_v12 = vshrl.u32 %v84_v11, 7 }
  0x2c   :  { %v69_v25 = vld [vmem:[#allocation2 + $0x98] sm:$0xff]  ;;  %v363_v26 = vpack.c.bf16 %v64_v23, %v62_v22  ;;  %v66_v28 = vld [vmem:[#allocation2 + $0x80] sm:$0xff]  ;;  %v68_v29 = vld [vmem:[#allocation2 + $0x90] sm:$0xff] }
  0x2d   :  { %v365_v27 = vpack.c.bf16 %v69_v25, %v67_v24  ;;  %v71_v30 = vld [vmem:[#allocation2 + $0xa8] sm:$0xff]  ;;  %v73_v31 = vld [vmem:[#allocation2 + $0xb8] sm:$0xff]  ;;  %v367_v32 = vpack.c.bf16 %v68_v29, %v66_v28  ;;  %v70_v34 = vld [vmem:[#allocation2 + $0xa0] sm:$0xff]  ;;  %v86_v13 = vsub.s32 0, %v85_v12  ;;  %v90_v28 = vsub.s32 1, %v85_v12 }
  0x2e   :  { %356 = vmatpush1.bf16.msra.mxu0 %v355_v14  ;;  %v369_v33 = vpack.c.bf16 %v73_v31, %v71_v30  ;;  %v72_v35 = vld [vmem:[#allocation2 + $0xb0] sm:$0xff]  ;;  %v75_v36 = vld [vmem:[#allocation2 + $0xc8] sm:$0xff]  ;;  %v77_v37 = vld [vmem:[#allocation2 + $0xd8] sm:$0xff] }
  0x2f   :  { %358 = vmatprep.subr.bf16.mxu0 %v357_v15  ;;  %v371_v38 = vpack.c.bf16 %v72_v35, %v70_v34  ;;  %v373_v39 = vpack.c.bf16 %v77_v37, %v75_v36  ;;  %v74_v40 = vld [vmem:[#allocation2 + $0xc0] sm:$0xff]  ;;  %v76_v41 = vld [vmem:[#allocation2 + $0xd0] sm:$0xff]  ;;  %v79_v42 = vld [vmem:[#allocation2 + $0xe8] sm:$0xff] }
  0x30   :  { %v81_v43 = vld [vmem:[#allocation2 + $0xf8] sm:$0xff]  ;;  %v375_v44 = vpack.c.bf16 %v76_v41, %v74_v40  ;;  %v78_v46 = vld [vmem:[#allocation2 + $0xe0] sm:$0xff]  ;;  %v80_v47 = vld [vmem:[#allocation2 + $0xf0] sm:$0xff] }
  0x31   :  { %v377_v45 = vpack.c.bf16 %v81_v43, %v79_v42  ;;  %v379_v48 = vpack.c.bf16 %v80_v47, %v78_v46  ;;  %v48_v49 = vld [vmem:[%s557_s0] sm:$0xff]  ;;  %v49_v50 = vld [vmem:[%s557_s0 + $0x8] sm:$0xff]  ;;  %v189_v54 = vld [vmem:[#allocation4 + $0x10] sm:$0xff] }
  0x32   :  { %360 = vmatpush1.bf16.msra.mxu0 %v359_v20  ;;  %v187_v51 = vld [vmem:[#allocation4] sm:$0xff]  ;;  %v188_v52 = vld [vmem:[#allocation4 + $0x8] sm:$0xff]  ;;  %v190_v55 = vld [vmem:[#allocation4 + $0x18] sm:$0xff] }
  0x33   :  { %362 = vmatprep.subr.bf16.mxu0 %v361_v21  ;;  %v381_v53 = vpack.c.bf16 %v188_v52, %v187_v51  ;;  %v385_v56 = vpack.c.bf16 %v190_v55, %v189_v54  ;;  %v191_v57 = vld [vmem:[#allocation4 + $0x20] sm:$0xff]  ;;  %v192_v58 = vld [vmem:[#allocation4 + $0x28] sm:$0xff]  ;;  %v193_v60 = vld [vmem:[#allocation4 + $0x30] sm:$0xff] }
  0x34   :  { %v389_v59 = vpack.c.bf16 %v192_v58, %v191_v57  ;;  %v194_v61 = vld [vmem:[#allocation4 + $0x38] sm:$0xff]  ;;  %v195_v63 = vld [vmem:[#allocation4 + $0x40] sm:$0xff]  ;;  %v197_v2 = vld [vmem:[#allocation4 + $0x50] sm:$0xff] }
  0x35   :  { %382 = vmatprep.subr.bf16.mxu1 %v381_v53  ;;  %v393_v62 = vpack.c.bf16 %v194_v61, %v193_v60  ;;  %v198_v3 = vld [vmem:[#allocation4 + $0x58] sm:$0xff]  ;;  %v199_v5 = vld [vmem:[#allocation4 + $0x60] sm:$0xff]  ;;  %v200_v6 = vld [vmem:[#allocation4 + $0x68] sm:$0xff] }
  0x36   :  { %364 = vmatpush1.bf16.msra.mxu0 %v363_v26  ;;  %384 = vmatpush3.bf16.msra.mxu1 %v381_v53  ;;  %v401_v4 = vpack.c.bf16 %v198_v3, %v197_v2  ;;  %v405_v7 = vpack.c.bf16 %v200_v6, %v199_v5  ;;  %v201_v8 = vld [vmem:[#allocation4 + $0x70] sm:$0xff]  ;;  %v202_v9 = vld [vmem:[#allocation4 + $0x78] sm:$0xff]  ;;  %v82_v14 = vld [vmem:[%s559_s2] sm:$0x3] }
  0x37   :  { %366 = vmatprep.subr.bf16.mxu0 %v365_v27  ;;  %386 = vmatprep.subr.bf16.mxu1 %v385_v56  ;;  %v409_v10 = vpack.c.bf16 %v202_v9, %v201_v8  ;;  %v87_v15 = vrot.slane %v82_v14, %v86_v13  ;;  %v91_v29 = vrot.slane %v82_v14, %v90_v28 }
  0x3a   :  { %368 = vmatpush1.bf16.msra.mxu0 %v367_v32  ;;  %388 = vmatpush3.bf16.msra.mxu1 %v385_v56 }
  0x3b   :  { %370 = vmatprep.subr.bf16.mxu0 %v369_v33  ;;  %390 = vmatprep.subr.bf16.mxu1 %v389_v59 }
  0x3e   :  { %372 = vmatpush1.bf16.msra.mxu0 %v371_v38  ;;  %392 = vmatpush3.bf16.msra.mxu1 %v389_v59  ;;  %v295_v38 = vld [vmem:[%s561_s4] ss:$0 sm:$0xff] }
  0x3f   :  { %374 = vmatprep.subr.bf16.mxu0 %v373_v39  ;;  %394 = vmatprep.subr.bf16.mxu1 %v393_v62 }
  0x42   :  { %376 = vmatpush1.bf16.msra.mxu0 %v375_v44  ;;  %396 = vmatpush3.bf16.msra.mxu1 %v393_v62 }
  0x43   :  { %378 = vmatprep.subr.bf16.mxu0 %v377_v45 }
  0x46   :  { %380 = vmatpush1.bf16.msra.mxu0 %v379_v48 }
  0x49   :  { %159 = vmatmul.mubr.f32.vlgmr.msra.gmra.mrb[0].mxu0 %v48_v49 }
  0x4a   :  { %164 = vmatprep.mubr.f32.mxu0 %v482_v0  ;;  %v196_v0 = vld [vmem:[#allocation4 + $0x48] sm:$0xff] }
  0x4b   :  { %v397_v1 = vpack.c.bf16 %v196_v0, %v195_v63 }
  0x4d   :  { %165 = vmatmul.mubr.f32.gmra.mrb[2].mxu0 %v49_v50  ;;  %398 = vmatprep.subr.bf16.mxu1 %v397_v1 }
  0x4e   :  { %400 = vmatpush3.bf16.msra.mxu1 %v397_v1 }
  0x4f   :  { %402 = vmatprep.subr.bf16.mxu1 %v401_v4 }
  0x52   :  { %404 = vmatpush3.bf16.msra.mxu1 %v401_v4 }
  0x53   :  { %406 = vmatprep.subr.bf16.mxu1 %v405_v7 }
  0x56   :  { %408 = vmatpush3.bf16.msra.mxu1 %v405_v7 }
  0x57   :  { %410 = vmatprep.subr.bf16.mxu1 %v409_v10 }
  0x5a   :  { %412 = vmatpush3.bf16.msra.mxu1 %v409_v10 }
 0x11c   :  { %v160_v16 = vpop.f32.mrb[0].mxu0 }
 0x11d   :  { %v161_v17 = vadd.f32 %v160_v16, %v87_v15  ;;  %v162_v18 = vpop.f32.mrb[1].mxu0 }
 0x11e   :  { %v163_v31 = vadd.f32 %v162_v18, %v91_v29 }
 0x11f   :  { %v293_v19 = vmul.f32 -1.442695, %v161_v17 }
 0x120   :  { %v166_v20 = vpop.f32.mrb[2].mxu0 }
 0x121   :  { %420 = vpow2.f32 %v293_v19  ;;  %v167_v21 = vadd.f32 %v166_v20, %v87_v15  ;;  %v168_v22 = vpop.f32.mrb[3].mxu0 }
 0x122   :  { %v169_v36 = vadd.f32 %v168_v22, %v91_v29 }
 0x123   :  { %v294_v23 = vmul.f32 -1.442695, %v167_v21 }
 0x125   :  { %422 = vpow2.f32 %v294_v23 }
 0x12b   :  { %v421_v24 = vpop.eup %420 }
 0x12c   :  { %v177_v25 = vadd.f32 1.0, %v421_v24 }
 0x12e   :  { %424 = vrcp.f32 %v177_v25 }
 0x12f   :  { %v423_v26 = vpop.eup %422 }
 0x130   :  { %v178_v27 = vadd.f32 1.0, %v423_v26 }
 0x132   :  { %426 = vrcp.f32 %v178_v27 }
 0x138   :  { %v425_v30 = vpop.eup %424 }
 0x139   :  { %v183_v32 = vmul.f32 %v425_v30, %v161_v17 }
 0x13b   :  { %v185_v33 = vmul.f32 %v183_v32, %v163_v31 }
 0x13c   :  { %v427_v34 = vpop.eup %426 }
 0x13d   :  { %v184_v35 = vmul.f32 %v427_v34, %v167_v21  ;;  %346 = vmatprep.mubr.f32.mxu1 %v185_v33 }
 0x13f   :  { %v186_v37 = vmul.f32 %v184_v35, %v169_v36 }
 0x141   :  { %347 = vmatmul.mubr.f32.vlgmr.msra.gmra.mrb[0].mxu1 %v186_v37 }
 0x214   :  { %v348_v39 = vpop.f32.mrb[0].mxu1 }
 0x215   :  { %v282_v40 = vadd.f32 %v348_v39, %v295_v38  ;;  %v276_v41 = vpop.f32.mrb[1].mxu1 }
 0x216   :  { %v277_v42 = vadd.f32 %v295_v38, %v276_v41 }
 0x217   :  { %286 = vst [vmem:[%s562_s5 + $0x8] sm:$0xff] %v282_v40 }
 0x218   :  { %285 = vst [vmem:[%s562_s5] sm:$0xff] %v277_v42 }
 0x219   :  { %291 = vsyncpa [#allocation3], 1 }
 0x21a   :  { %292 = vsyncpa [#allocation5], 1 }

// kernel: glu_forward_fused.1
= control target key start
LH: loop header
LB: loop body
LE: loop exit
PB: predicated region body
PF: predicated region fallthrough
CT: control target
= control target key end

     0   :  { %10 = vsyncpa [#allocation3], 0  ;;  %s557_s0 = inlined_call_operand.vmem [shape: f32[16,128], index: 0, kind: input, shape index: {}]   ;;  %s558_s1 = inlined_call_operand.hbm [shape: f32[128,256], index: 1, kind: input, shape index: {}]   ;;  %s559_s2 = inlined_call_operand.vmem [shape: f32[1,256], index: 2, kind: input, shape index: {}]   ;;  %s560_s3 = inlined_call_operand.hbm [shape: f32[128,128], index: 3, kind: input, shape index: {}]   ;;  %s561_s4 = inlined_call_operand.vmem [shape: f32[1,128], index: 4, kind: input, shape index: {}]   ;;  %s562_s5 = inlined_call_operand.vmem [shape: f32[16,128], index: 5, kind: output, shape index: {}]  }
   0x1   :  { %11 = vsyncpa [#allocation5], 0  ;;  %s476_s18 = smov [#allocation2]   ;;  %s428_s22 = scalar_lea.hbm %s558_s1, 4096 }
   0x2   :  { %s19_s19 = sshll.u32 %s476_s18, 4  ;;  %p429_p0 = scmp.ne.s32.totalorder %s558_s1, %s428_s22  ;;  %s20_s19 = int_to_ptr.vmem [resolvable:$true] %s19_s19 }
   0x3   :  { %p432_p1 = scmp.lt.u32.totalorder %s428_s22, %s558_s1 }
   0x5   :  { %p434_p2 = pnand %p432_p1, %p429_p0 }
   0x7   :  { %437 = shalt.err (!%p434_p2)
}
   0x8   :  { %s438_s27 = scalar_lea.vmem %s20_s19, 4096  ;;  %p443_p4 = scmp.lt.s32.totalorder %s20_s19, %s20_s19 }
   0x9   :  { %p439_p3 = scmp.ne.s32.totalorder %s20_s19, %s438_s27  ;;  %p444_p5 = scmp.lt.s32.totalorder %s438_s27, %s438_s27 }
   0xb   :  { %p445_p6 = por %p444_p5, %p443_p4 }
   0xd   :  { %p446_p7 = pnand %p445_p6, %p439_p3 }
   0xf   :  { %449 = shalt.err (!%p446_p7)
}
  0x10   :  { %s477_s28 = smov 256   ;;  %s478_s29 = smov 16  }
  0x11   :  { %25 = dma.hbm_to_vmem [thread:$0]  %s558_s1, 4096, %s20_s19, [#allocation3], %s477_s28, %s477_s28, %s478_s29  }
  0x12   :  { %s479_s7 = smov [#allocation4]   ;;  %s450_s11 = scalar_lea.hbm %s560_s3, 2048 }
  0x13   :  { %s33_s8 = sshll.u32 %s479_s7, 4  ;;  %p451_p8 = scmp.ne.s32.totalorder %s560_s3, %s450_s11  ;;  %s34_s8 = int_to_ptr.vmem [resolvable:$true] %s33_s8 }
  0x14   :  { %p454_p9 = scmp.lt.u32.totalorder %s450_s11, %s560_s3 }
  0x16   :  { %p456_p10 = pnand %p454_p9, %p451_p8 }
  0x18   :  { %459 = shalt.err (!%p456_p10)
}
  0x19   :  { %s460_s16 = scalar_lea.vmem %s34_s8, 2048  ;;  %p465_p12 = scmp.lt.s32.totalorder %s34_s8, %s34_s8 }
  0x1a   :  { %p461_p11 = scmp.ne.s32.totalorder %s34_s8, %s460_s16  ;;  %p466_p13 = scmp.lt.s32.totalorder %s460_s16, %s460_s16 }
  0x1c   :  { %p467_p0 = por %p466_p13, %p465_p12 }
  0x1e   :  { %p468_p1 = pnand %p467_p0, %p461_p11 }
  0x20   :  { %471 = shalt.err (!%p468_p1)
}
  0x21   :  { %s480_s1 = smov 128   ;;  %s481_s17 = smov 8  }
  0x22   :  { %39 = dma.hbm_to_vmem [thread:$0]  %s560_s3, 2048, %s34_s8, [#allocation5], %s480_s1, %s480_s1, %s481_s17  }
  0x23   :  { %472 = dma.done.wait [#allocation3], 4096  }
  0x24   :  { %473 = vsyncadd [#allocation3], 4294963200 }
  0x25   :  { %474 = dma.done.wait [#allocation5], 2048  }
  0x26   :  { %475 = vsyncadd [#allocation5], 4294965248  ;;  %v482_v0 = vmov 0.0   ;;  %v51_v1 = vld [vmem:[#allocation2 + $0x8] sm:$0xff]  ;;  %v53_v2 = vld [vmem:[#allocation2 + $0x18] sm:$0xff] }
  0x27   :  { %158 = vmatprep.mubr.f32.mxu0 %v482_v0  ;;  %v50_v3 = vld [vmem:[#allocation2] sm:$0xff]  ;;  %v349_v4 = vpack.c.bf16 %v53_v2, %v51_v1  ;;  %v52_v5 = vld [vmem:[#allocation2 + $0x10] sm:$0xff]  ;;  %v55_v6 = vld [vmem:[#allocation2 + $0x28] sm:$0xff] }
  0x28   :  { %v57_v7 = vld [vmem:[#allocation2 + $0x38] sm:$0xff]  ;;  %v351_v8 = vpack.c.bf16 %v52_v5, %v50_v3  ;;  %v54_v10 = vld [vmem:[#allocation2 + $0x20] sm:$0xff]  ;;  %v56_v11 = vld [vmem:[#allocation2 + $0x30] sm:$0xff] }
  0x29   :  { %v353_v9 = vpack.c.bf16 %v57_v7, %v55_v6  ;;  %v59_v12 = vld [vmem:[#allocation2 + $0x48] sm:$0xff]  ;;  %350 = vmatprep.subr.bf16.mxu0 %v349_v4  ;;  %v61_v13 = vld [vmem:[#allocation2 + $0x58] sm:$0xff]  ;;  %v355_v14 = vpack.c.bf16 %v56_v11, %v54_v10  ;;  %v58_v16 = vld [vmem:[#allocation2 + $0x40] sm:$0xff]  ;;  %v84_v11 = vlaneseq }
  0x2a   :  { %352 = vmatpush1.bf16.msra.mxu0 %v351_v8  ;;  %v357_v15 = vpack.c.bf16 %v61_v13, %v59_v12  ;;  %v60_v17 = vld [vmem:[#allocation2 + $0x50] sm:$0xff]  ;;  %v63_v18 = vld [vmem:[#allocation2 + $0x68] sm:$0xff]  ;;  %v65_v19 = vld [vmem:[#allocation2 + $0x78] sm:$0xff] }
  0x2b   :  { %354 = vmatprep.subr.bf16.mxu0 %v353_v9  ;;  %v359_v20 = vpack.c.bf16 %v60_v17, %v58_v16  ;;  %v361_v21 = vpack.c.bf16 %v65_v19, %v63_v18  ;;  %v62_v22 = vld [vmem:[#allocation2 + $0x60] sm:$0xff]  ;;  %v64_v23 = vld [vmem:[#allocation2 + $0x70] sm:$0xff]  ;;  %v67_v24 = vld [vmem:[#allocation2 + $0x88] sm:$0xff]  ;;  %v85_v12 = vshrl.u32 %v84_v11, 7 }
  0x2c   :  { %v69_v25 = vld [vmem:[#allocation2 + $0x98] sm:$0xff]  ;;  %v363_v26 = vpack.c.bf16 %v64_v23, %v62_v22  ;;  %v66_v28 = vld [vmem:[#allocation2 + $0x80] sm:$0xff]  ;;  %v68_v29 = vld [vmem:[#allocation2 + $0x90] sm:$0xff] }
  0x2d   :  { %v365_v27 = vpack.c.bf16 %v69_v25, %v67_v24  ;;  %v71_v30 = vld [vmem:[#allocation2 + $0xa8] sm:$0xff]  ;;  %v73_v31 = vld [vmem:[#allocation2 + $0xb8] sm:$0xff]  ;;  %v367_v32 = vpack.c.bf16 %v68_v29, %v66_v28  ;;  %v70_v34 = vld [vmem:[#allocation2 + $0xa0] sm:$0xff]  ;;  %v86_v13 = vsub.s32 0, %v85_v12  ;;  %v90_v28 = vsub.s32 1, %v85_v12 }
  0x2e   :  { %356 = vmatpush1.bf16.msra.mxu0 %v355_v14  ;;  %v369_v33 = vpack.c.bf16 %v73_v31, %v71_v30  ;;  %v72_v35 = vld [vmem:[#allocation2 + $0xb0] sm:$0xff]  ;;  %v75_v36 = vld [vmem:[#allocation2 + $0xc8] sm:$0xff]  ;;  %v77_v37 = vld [vmem:[#allocation2 + $0xd8] sm:$0xff] }
  0x2f   :  { %358 = vmatprep.subr.bf16.mxu0 %v357_v15  ;;  %v371_v38 = vpack.c.bf16 %v72_v35, %v70_v34  ;;  %v373_v39 = vpack.c.bf16 %v77_v37, %v75_v36  ;;  %v74_v40 = vld [vmem:[#allocation2 + $0xc0] sm:$0xff]  ;;  %v76_v41 = vld [vmem:[#allocation2 + $0xd0] sm:$0xff]  ;;  %v79_v42 = vld [vmem:[#allocation2 + $0xe8] sm:$0xff] }
  0x30   :  { %v81_v43 = vld [vmem:[#allocation2 + $0xf8] sm:$0xff]  ;;  %v375_v44 = vpack.c.bf16 %v76_v41, %v74_v40  ;;  %v78_v46 = vld [vmem:[#allocation2 + $0xe0] sm:$0xff]  ;;  %v80_v47 = vld [vmem:[#allocation2 + $0xf0] sm:$0xff] }
  0x31   :  { %v377_v45 = vpack.c.bf16 %v81_v43, %v79_v42  ;;  %v379_v48 = vpack.c.bf16 %v80_v47, %v78_v46  ;;  %v48_v49 = vld [vmem:[%s557_s0] sm:$0xff]  ;;  %v49_v50 = vld [vmem:[%s557_s0 + $0x8] sm:$0xff]  ;;  %v189_v54 = vld [vmem:[#allocation4 + $0x10] sm:$0xff] }
  0x32   :  { %360 = vmatpush1.bf16.msra.mxu0 %v359_v20  ;;  %v187_v51 = vld [vmem:[#allocation4] sm:$0xff]  ;;  %v188_v52 = vld [vmem:[#allocation4 + $0x8] sm:$0xff]  ;;  %v190_v55 = vld [vmem:[#allocation4 + $0x18] sm:$0xff] }
  0x33   :  { %362 = vmatprep.subr.bf16.mxu0 %v361_v21  ;;  %v381_v53 = vpack.c.bf16 %v188_v52, %v187_v51  ;;  %v385_v56 = vpack.c.bf16 %v190_v55, %v189_v54  ;;  %v191_v57 = vld [vmem:[#allocation4 + $0x20] sm:$0xff]  ;;  %v192_v58 = vld [vmem:[#allocation4 + $0x28] sm:$0xff]  ;;  %v193_v60 = vld [vmem:[#allocation4 + $0x30] sm:$0xff] }
  0x34   :  { %v389_v59 = vpack.c.bf16 %v192_v58, %v191_v57  ;;  %v194_v61 = vld [vmem:[#allocation4 + $0x38] sm:$0xff]  ;;  %v195_v63 = vld [vmem:[#allocation4 + $0x40] sm:$0xff]  ;;  %v197_v2 = vld [vmem:[#allocation4 + $0x50] sm:$0xff] }
  0x35   :  { %382 = vmatprep.subr.bf16.mxu1 %v381_v53  ;;  %v393_v62 = vpack.c.bf16 %v194_v61, %v193_v60  ;;  %v198_v3 = vld [vmem:[#allocation4 + $0x58] sm:$0xff]  ;;  %v199_v5 = vld [vmem:[#allocation4 + $0x60] sm:$0xff]  ;;  %v200_v6 = vld [vmem:[#allocation4 + $0x68] sm:$0xff] }
  0x36   :  { %364 = vmatpush1.bf16.msra.mxu0 %v363_v26  ;;  %384 = vmatpush3.bf16.msra.mxu1 %v381_v53  ;;  %v401_v4 = vpack.c.bf16 %v198_v3, %v197_v2  ;;  %v405_v7 = vpack.c.bf16 %v200_v6, %v199_v5  ;;  %v201_v8 = vld [vmem:[#allocation4 + $0x70] sm:$0xff]  ;;  %v202_v9 = vld [vmem:[#allocation4 + $0x78] sm:$0xff]  ;;  %v82_v14 = vld [vmem:[%s559_s2] sm:$0x3] }
  0x37   :  { %366 = vmatprep.subr.bf16.mxu0 %v365_v27  ;;  %386 = vmatprep.subr.bf16.mxu1 %v385_v56  ;;  %v409_v10 = vpack.c.bf16 %v202_v9, %v201_v8  ;;  %v87_v15 = vrot.slane %v82_v14, %v86_v13  ;;  %v91_v29 = vrot.slane %v82_v14, %v90_v28 }
  0x3a   :  { %368 = vmatpush1.bf16.msra.mxu0 %v367_v32  ;;  %388 = vmatpush3.bf16.msra.mxu1 %v385_v56 }
  0x3b   :  { %370 = vmatprep.subr.bf16.mxu0 %v369_v33  ;;  %390 = vmatprep.subr.bf16.mxu1 %v389_v59 }
  0x3e   :  { %372 = vmatpush1.bf16.msra.mxu0 %v371_v38  ;;  %392 = vmatpush3.bf16.msra.mxu1 %v389_v59  ;;  %v295_v38 = vld [vmem:[%s561_s4] ss:$0 sm:$0xff] }
  0x3f   :  { %374 = vmatprep.subr.bf16.mxu0 %v373_v39  ;;  %394 = vmatprep.subr.bf16.mxu1 %v393_v62 }
  0x42   :  { %376 = vmatpush1.bf16.msra.mxu0 %v375_v44  ;;  %396 = vmatpush3.bf16.msra.mxu1 %v393_v62 }
  0x43   :  { %378 = vmatprep.subr.bf16.mxu0 %v377_v45 }
  0x46   :  { %380 = vmatpush1.bf16.msra.mxu0 %v379_v48 }
  0x49   :  { %159 = vmatmul.mubr.f32.vlgmr.msra.gmra.mrb[0].mxu0 %v48_v49 }
  0x4a   :  { %164 = vmatprep.mubr.f32.mxu0 %v482_v0  ;;  %v196_v0 = vld [vmem:[#allocation4 + $0x48] sm:$0xff] }
  0x4b   :  { %v397_v1 = vpack.c.bf16 %v196_v0, %v195_v63 }
  0x4d   :  { %165 = vmatmul.mubr.f32.gmra.mrb[2].mxu0 %v49_v50  ;;  %398 = vmatprep.subr.bf16.mxu1 %v397_v1 }
  0x4e   :  { %400 = vmatpush3.bf16.msra.mxu1 %v397_v1 }
  0x4f   :  { %402 = vmatprep.subr.bf16.mxu1 %v401_v4 }
  0x52   :  { %404 = vmatpush3.bf16.msra.mxu1 %v401_v4 }
  0x53   :  { %406 = vmatprep.subr.bf16.mxu1 %v405_v7 }
  0x56   :  { %408 = vmatpush3.bf16.msra.mxu1 %v405_v7 }
  0x57   :  { %410 = vmatprep.subr.bf16.mxu1 %v409_v10 }
  0x5a   :  { %412 = vmatpush3.bf16.msra.mxu1 %v409_v10 }
 0x11c   :  { %v160_v16 = vpop.f32.mrb[0].mxu0 }
 0x11d   :  { %v161_v17 = vadd.f32 %v160_v16, %v87_v15  ;;  %v162_v18 = vpop.f32.mrb[1].mxu0 }
 0x11e   :  { %v163_v31 = vadd.f32 %v162_v18, %v91_v29 }
 0x11f   :  { %v293_v19 = vmul.f32 -1.442695, %v161_v17 }
 0x120   :  { %v166_v20 = vpop.f32.mrb[2].mxu0 }
 0x121   :  { %420 = vpow2.f32 %v293_v19  ;;  %v167_v21 = vadd.f32 %v166_v20, %v87_v15  ;;  %v168_v22 = vpop.f32.mrb[3].mxu0 }
 0x122   :  { %v169_v36 = vadd.f32 %v168_v22, %v91_v29 }
 0x123   :  { %v294_v23 = vmul.f32 -1.442695, %v167_v21 }
 0x125   :  { %422 = vpow2.f32 %v294_v23 }
 0x12b   :  { %v421_v24 = vpop.eup %420 }
 0x12c   :  { %v177_v25 = vadd.f32 1.0, %v421_v24 }
 0x12e   :  { %424 = vrcp.f32 %v177_v25 }
 0x12f   :  { %v423_v26 = vpop.eup %422 }
 0x130   :  { %v178_v27 = vadd.f32 1.0, %v423_v26 }
 0x132   :  { %426 = vrcp.f32 %v178_v27 }
 0x138   :  { %v425_v30 = vpop.eup %424 }
 0x139   :  { %v183_v32 = vmul.f32 %v425_v30, %v161_v17 }
 0x13b   :  { %v185_v33 = vmul.f32 %v183_v32, %v163_v31 }
 0x13c   :  { %v427_v34 = vpop.eup %426 }
 0x13d   :  { %v184_v35 = vmul.f32 %v427_v34, %v167_v21  ;;  %346 = vmatprep.mubr.f32.mxu1 %v185_v33 }
 0x13f   :  { %v186_v37 = vmul.f32 %v184_v35, %v169_v36 }
 0x141   :  { %347 = vmatmul.mubr.f32.vlgmr.msra.gmra.mrb[0].mxu1 %v186_v37 }
 0x214   :  { %v348_v39 = vpop.f32.mrb[0].mxu1 }
 0x215   :  { %v282_v40 = vadd.f32 %v348_v39, %v295_v38  ;;  %v276_v41 = vpop.f32.mrb[1].mxu1 }
 0x216   :  { %v277_v42 = vadd.f32 %v295_v38, %v276_v41 }
 0x217   :  { %286 = vst [vmem:[%s562_s5 + $0x8] sm:$0xff] %v282_v40 }
 0x218   :  { %285 = vst [vmem:[%s562_s5] sm:$0xff] %v277_v42 }
 0x219   :  { %291 = vsyncpa [#allocation3], 1 }
 0x21a   :  { %292 = vsyncpa [#allocation5], 1 }

</bundles_post_ra>
